<compile_context>
chip_gen: v6e
topology: v6e:2x2x1
jax: 0.10.0
libtpu: 0.0.40
codegen_flags: <defaults>
</compile_context>

<pallas_src>
import jax
import jax.numpy as jnp
from jax.experimental import pallas as pl
from jax.experimental.pallas import tpu as pltpu

BN_EPS = 1e-5
_LANE = 128
_SUBLANE = 8
_TARGET_BATCH_TILE = 512                  # preferred rows per batch tile
_STATS_SPLITS = 2                         # leading 'parallel' axis of pass 1
_VMEM_TILE_BUDGET = 40 * 1024 * 1024      # per-step working-set budget (all gens)
_VMEM_LIMIT_BYTES = 56 * 1024 * 1024      # scoped VMEM limit (< v7x 64 MiB physical)


def _round_up(n: int, m: int) -> int:
    return (n + m - 1) // m * m


def _cdiv(a: int, b: int) -> int:
    return (a + b - 1) // b


def _pass1_vmem(tb, d_in, h_p, in_isz, h_isz):
    return (2 * tb * d_in * in_isz                 # x blocks (double-buffered)
            + 1 * d_in * h_p * in_isz              # W1 (Buffered(1), grid-invariant)
            + 2 * tb * h_p * h_isz                 # h output blocks
            + 2 * _STATS_SPLITS * 2 * h_p * 4      # stats accumulator
            + 2 * tb * h_p * 4)                    # f32 intermediates headroom


def _pass2_vmem(tb, h_p, d_out_p, in_isz, h_isz):
    return (2 * tb * h_p * h_isz                   # h blocks
            + 1 * h_p * d_out_p * in_isz           # W2 (Buffered(1))
            + 2 * tb * d_out_p * in_isz            # out blocks
            + 2 * tb * h_p * 4                     # f32 intermediates
            + 4 * (2 * h_p + d_out_p) * 4)         # scale/shift/b2


def _choose_batch_tiling(B, d_in, h_p, d_out_p, in_isz, h_isz):
    """Pick (nb, tb): nb even and >= 2 (megacore), balanced padding, VMEM-bounded."""
    nb = max(_STATS_SPLITS, _cdiv(B, _TARGET_BATCH_TILE))
    nb = _round_up(nb, _STATS_SPLITS)
    tb = _round_up(_cdiv(B, nb), _SUBLANE)
    while tb > _SUBLANE and max(
            _pass1_vmem(tb, d_in, h_p, in_isz, h_isz),
            _pass2_vmem(tb, h_p, d_out_p, in_isz, h_isz)) > _VMEM_TILE_BUDGET:
        nb = _round_up(nb * 2, _STATS_SPLITS)
        tb = _round_up(_cdiv(B, nb), _SUBLANE)
    return nb, tb


def _stats_kernel(x_ref, w1_ref, h_ref, stats_ref):
    """Pass 1: h = x @ W1 (stored for reuse) + per-feature sum / sum-of-squares."""
    @pl.when(pl.program_id(1) == 0)
    def _init():
        stats_ref[...] = jnp.zeros_like(stats_ref)

    h = jnp.dot(x_ref[...], w1_ref[...], preferred_element_type=jnp.float32)
    h_ref[...] = h.astype(h_ref.dtype)

    s = jnp.sum(h, axis=0, keepdims=True)        # (1, H_p)
    ss = jnp.sum(h * h, axis=0, keepdims=True)   # (1, H_p)
    stats_ref[...] = stats_ref[...] + jnp.concatenate([s, ss], axis=0)[None, :, :]


def _proj_kernel(h_ref, scale_ref, shift_ref, w2_ref, b2_ref, o_ref):
    """Pass 2: BN affine (precomputed scale/shift) + ReLU + projection + bias."""
    h = h_ref[...].astype(jnp.float32)
    r = jnp.maximum(h * scale_ref[...] + shift_ref[...], 0.0)
    out = jnp.dot(r.astype(w2_ref.dtype), w2_ref[...],
                  preferred_element_type=jnp.float32)
    o_ref[...] = (out + b2_ref[...].astype(jnp.float32)).astype(o_ref.dtype)


def mlp_forward(x, w1, gamma, beta, w2, b2):
    """x: (B, D_in); w1: (D_in, H); gamma/beta: (1, H); w2: (H, D_out); b2: (1, D_out)."""
    B, D_in = x.shape
    H = w1.shape[1]
    D_out = w2.shape[1]

    H_p = _round_up(H, _LANE)
    D_out_p = _round_up(D_out, _LANE)

    h_dtype = x.dtype                      # h stored at input precision (exact for f32)
    in_isz = x.dtype.itemsize
    h_isz = jnp.dtype(h_dtype).itemsize

    nb, tb = _choose_batch_tiling(B, D_in, H_p, D_out_p, in_isz, h_isz)
    B_p = nb * tb
    nbh = nb // _STATS_SPLITS

    def pad2(a, rows, cols):
        pr, pc = rows - a.shape[0], cols - a.shape[1]
        return a if (pr == 0 and pc == 0) else jnp.pad(a, ((0, pr), (0, pc)))

    xp = pad2(x, B_p, D_in)        # zero rows contribute 0 to sums -> stats exact
    w1p = pad2(w1, D_in, H_p)      # padded H columns of h are exactly 0
    gp = pad2(gamma, 1, H_p)       # gamma pad = 0 -> padded features stay 0 post-BN
    bp = pad2(beta, 1, H_p)
    w2p = pad2(w2, H_p, D_out_p)
    b2p = pad2(b2, 1, D_out_p)

    # ---- Pass 1: h = x @ W1 (once) + per-core-partial BN statistics -------------
    h, stats = pl.pallas_call(
        _stats_kernel,
        out_shape=(jax.ShapeDtypeStruct((B_p, H_p), h_dtype),
                   jax.ShapeDtypeStruct((_STATS_SPLITS, 2, H_p), jnp.float32)),
        grid=(_STATS_SPLITS, nbh),
        in_specs=[
            pl.BlockSpec((tb, D_in), lambda c, i: (c * nbh + i, 0)),
            pl.BlockSpec((D_in, H_p), lambda c, i: (0, 0),
                         pipeline_mode=pl.Buffered(1)),       # grid-invariant W1
        ],
        out_specs=(
            pl.BlockSpec((tb, H_p), lambda c, i: (c * nbh + i, 0)),
            pl.BlockSpec((1, 2, H_p), lambda c, i: (c, 0, 0)),  # resident per core-split
        ),
        compiler_params=pltpu.CompilerParams(
            dimension_semantics=("parallel", "arbitrary"),
            vmem_limit_bytes=_VMEM_LIMIT_BYTES),
        cost_estimate=pl.CostEstimate(
            flops=2 * B_p * D_in * H_p,
            transcendentals=0,
            bytes_accessed=((B_p * D_in + D_in * H_p) * in_isz
                            + B_p * H_p * h_isz + _STATS_SPLITS * 2 * H_p * 4)),
    )(xp, w1p)

    # ---- BN scale/shift from full-batch (train-mode, biased) statistics ---------
    tot = jnp.sum(stats, axis=0)                                # (2, H_p)
    mean = tot[0:1] / B                                         # true B, not B_p
    var = jnp.maximum(tot[1:2] / B - mean * mean, 0.0)          # biased variance
    scale = gp.astype(jnp.float32) * jax.lax.rsqrt(var + BN_EPS)
    shift = bp.astype(jnp.float32) - mean * scale

    # ---- Pass 2: normalize + ReLU + projection (no x@W1 recompute) --------------
    out = pl.pallas_call(
        _proj_kernel,
        out_shape=jax.ShapeDtypeStruct((B_p, D_out_p), x.dtype),
        grid=(nb,),
        in_specs=[
            pl.BlockSpec((tb, H_p), lambda i: (i, 0)),
            pl.BlockSpec((1, H_p), lambda i: (0, 0)),
            pl.BlockSpec((1, H_p), lambda i: (0, 0)),
            pl.BlockSpec((H_p, D_out_p), lambda i: (0, 0),
                         pipeline_mode=pl.Buffered(1)),        # grid-invariant W2
            pl.BlockSpec((1, D_out_p), lambda i: (0, 0)),
        ],
        out_specs=pl.BlockSpec((tb, D_out_p), lambda i: (i, 0)),
        compiler_params=pltpu.CompilerParams(
            dimension_semantics=("parallel",),
            vmem_limit_bytes=_VMEM_LIMIT_BYTES),
        cost_estimate=pl.CostEstimate(
            flops=2 * B_p * H_p * D_out_p,
            transcendentals=0,
            bytes_accessed=(B_p * H_p * h_isz + H_p * D_out_p * in_isz
                            + (2 * H_p + D_out_p) * 4
                            + B_p * D_out_p * in_isz)),
    )(h, scale, shift, w2p, b2p)

    return out[:B, :D_out]


def reference_forward(x, w1, gamma, beta, w2, b2):
    h = x @ w1
    mean = jnp.mean(h, axis=0, keepdims=True)
    var = jnp.mean((h - mean) ** 2, axis=0, keepdims=True)   # biased (train-mode BN)
    hn = (h - mean) / jnp.sqrt(var + BN_EPS) * gamma + beta
    r = jnp.maximum(hn, 0.0)
    return r @ w2 + b2


if __name__ == "__main__":
    # Small shapes consistent with the module's Linear variant.
    B, D_in, H, D_out = 8, 32, 64, 16

    key = jax.random.PRNGKey(0)
    kx, kw1, kw2, kb2 = jax.random.split(key, 4)

    x = jax.random.normal(kx, (B, D_in), dtype=jnp.float32)

    # Deterministic synthetic parameters (shapes from the module __init__).
    w1 = jax.random.normal(kw1, (D_in, H), dtype=jnp.float32) * 0.1   # Linear1 weight (bias=False)
    gamma = jnp.ones((1, H), dtype=jnp.float32)                       # BatchNorm1d weight
    beta = jnp.zeros((1, H), dtype=jnp.float32)                       # BatchNorm1d bias
    w2 = jax.random.normal(kw2, (H, D_out), dtype=jnp.float32) * 0.1  # Linear2 weight
    b2 = jax.random.normal(kb2, (1, D_out), dtype=jnp.float32) * 0.1  # Linear2 bias

    out = mlp_forward(x, w1, gamma, beta, w2, b2)
    out = jax.block_until_ready(out)

    ref = reference_forward(x, w1, gamma, beta, w2, b2)
    assert out.shape == (B, D_out)
    assert jnp.allclose(out, ref, atol=1e-4, rtol=1e-4), "mismatch vs JAX reference"

    print("KERNEL_OK")
</pallas_src>

<mosaic_0001>
module attributes {stable_mosaic.version = 11 : i64} {
  func.func @_stats_kernel(%arg0: i32, %arg1: i32, %arg2: memref<8x32xf32, #tpu.memory_space<vmem>>, %arg3: memref<32x128xf32, #tpu.memory_space<vmem>>, %arg4: memref<8x128xf32, #tpu.memory_space<vmem>>, %arg5: memref<1x2x128xf32, #tpu.memory_space<vmem>>) attributes {dimension_semantics = [#tpu.dimension_semantics<parallel>, #tpu.dimension_semantics<arbitrary>], iteration_bounds = array<i64: 2, 1>, scalar_prefetch = 0 : i64, scratch_operands = 0 : i64, tpu.core_type = #tpu.core_type<tc>, window_params = [{transform_indices = @transform_0, window_bounds = array<i64: 8, 32>}, {pipeline_mode = #tpu.pipeline_mode<synchronous>, transform_indices = @transform_1, window_bounds = array<i64: 32, 128>}, {transform_indices = @transform_2, window_bounds = array<i64: 8, 128>}, {transform_indices = @transform_3, window_bounds = array<i64: 1, 2, 128>}]} {
    %c0_i32 = arith.constant 0 : i32
    %0 = arith.cmpi eq, %arg1, %c0_i32 : i32
    %1 = arith.extui %0 : i1 to i32
    %c0_i32_0 = arith.constant 0 : i32
    %2 = arith.cmpi ne, %1, %c0_i32_0 : i32
    scf.if %2 {
      %cst_14 = arith.constant 0.000000e+00 : f32
      %17 = vector.broadcast %cst_14 : f32 to vector<1x2x128xf32>
      %c0_15 = arith.constant 0 : index
      %c0_16 = arith.constant 0 : index
      %c0_17 = arith.constant 0 : index
      %18 = vector.load %arg5[%c0_15, %c0_16, %c0_17] : memref<1x2x128xf32, #tpu.memory_space<vmem>>, vector<1x2x128xf32>
      tpu.vector_store %arg5[%c0_15, %c0_16, %c0_17], %17 {strides = array<i32>} : memref<1x2x128xf32, #tpu.memory_space<vmem>>, vector<1x2x128xf32>,
    } else {
    }
    %c0 = arith.constant 0 : index
    %c0_1 = arith.constant 0 : index
    %3 = vector.load %arg2[%c0, %c0_1] : memref<8x32xf32, #tpu.memory_space<vmem>>, vector<8x32xf32>
    %c0_2 = arith.constant 0 : index
    %c0_3 = arith.constant 0 : index
    %4 = vector.load %arg3[%c0_2, %c0_3] : memref<32x128xf32, #tpu.memory_space<vmem>>, vector<32x128xf32>
    %cst = arith.constant dense<0.000000e+00> : vector<8x128xf32>
    %5 = tpu.matmul %3, %4, %cst {dimension_numbers = #tpu.dot_dimension_numbers<[1], [0], [0], [1], [0, 0, 1, 1], [], []>} : vector<8x32xf32>, vector<32x128xf32>, vector<8x128xf32> -> vector<8x128xf32>
    %c0_4 = arith.constant 0 : index
    %c0_5 = arith.constant 0 : index
    %6 = vector.load %arg4[%c0_4, %c0_5] : memref<8x128xf32, #tpu.memory_space<vmem>>, vector<8x128xf32>
    tpu.vector_store %arg4[%c0_4, %c0_5], %5 {strides = array<i32>} : memref<8x128xf32, #tpu.memory_space<vmem>>, vector<8x128xf32>,
    %cst_6 = arith.constant dense<0.000000e+00> : vector<128xf32>
    %7 = vector.multi_reduction <add>, %5, %cst_6 [0] : vector<8x128xf32> to vector<128xf32>
    %8 = vector.shape_cast %7 : vector<128xf32> to vector<1x128xf32>
    %9 = arith.mulf %5, %5 : vector<8x128xf32>
    %cst_7 = arith.constant dense<0.000000e+00> : vector<128xf32>
    %10 = vector.multi_reduction <add>, %9, %cst_7 [0] : vector<8x128xf32> to vector<128xf32>
    %11 = vector.shape_cast %10 : vector<128xf32> to vector<1x128xf32>
    %c0_8 = arith.constant 0 : index
    %c0_9 = arith.constant 0 : index
    %c0_10 = arith.constant 0 : index
    %12 = vector.load %arg5[%c0_8, %c0_9, %c0_10] : memref<1x2x128xf32, #tpu.memory_space<vmem>>, vector<1x2x128xf32>
    %13 = tpu.concatenate %8, %11 in 0 : vector<1x128xf32>, vector<1x128xf32> -> vector<2x128xf32>
    %14 = vector.shape_cast %13 : vector<2x128xf32> to vector<1x2x128xf32>
    %15 = arith.addf %12, %14 : vector<1x2x128xf32>
    %c0_11 = arith.constant 0 : index
    %c0_12 = arith.constant 0 : index
    %c0_13 = arith.constant 0 : index
    %16 = vector.load %arg5[%c0_11, %c0_12, %c0_13] : memref<1x2x128xf32, #tpu.memory_space<vmem>>, vector<1x2x128xf32>
    tpu.vector_store %arg5[%c0_11, %c0_12, %c0_13], %15 {strides = array<i32>} : memref<1x2x128xf32, #tpu.memory_space<vmem>>, vector<1x2x128xf32>,
    return
  }
  func.func @transform_0(%arg0: i32, %arg1: i32) -> (i32, i32) {
    %c1_i32 = arith.constant 1 : i32
    %0 = arith.muli %arg0, %c1_i32 : i32
    %1 = arith.addi %0, %arg1 : i32
    %c0_i32 = arith.constant 0 : i32
    %c0_i32_0 = arith.constant 0 : i32
    return %1, %c0_i32 : i32, i32
  }
  func.func @transform_1(%arg0: i32, %arg1: i32) -> (i32, i32) {
    %c0_i32 = arith.constant 0 : i32
    %c0_i32_0 = arith.constant 0 : i32
    %c0_i32_1 = arith.constant 0 : i32
    return %c0_i32, %c0_i32_0 : i32, i32
  }
  func.func @transform_2(%arg0: i32, %arg1: i32) -> (i32, i32) {
    %c1_i32 = arith.constant 1 : i32
    %0 = arith.muli %arg0, %c1_i32 : i32
    %1 = arith.addi %0, %arg1 : i32
    %c0_i32 = arith.constant 0 : i32
    %c0_i32_0 = arith.constant 0 : i32
    return %1, %c0_i32 : i32, i32
  }
  func.func @transform_3(%arg0: i32, %arg1: i32) -> (i32, i32, i32) {
    %c0_i32 = arith.constant 0 : i32
    %c0_i32_0 = arith.constant 0 : i32
    %c0_i32_1 = arith.constant 0 : i32
    return %arg0, %c0_i32, %c0_i32_0 : i32, i32, i32
  }
}

</mosaic_0001>

<bundles_post_ra>
// kernel: tpu_custom_call.1
= control target key start
LH: loop header
LB: loop body
LE: loop exit
PB: predicated region body
PF: predicated region fallthrough
CT: control target
= control target key end

     0   :  { %9 = vsyncpa [#allocation3], 0  ;;  %s1007_s0 = inlined_call_operand.hbm [shape: f32[16,32], index: 0, kind: input, shape index: {}]   ;;  %s1008_s1 = inlined_call_operand.hbm [shape: f32[32,128], index: 1, kind: input, shape index: {}]   ;;  %s1009_s2 = inlined_call_operand.hbm [shape: f32[16,128], index: 2, kind: output, shape index: {0}]   ;;  %s1010_s3 = inlined_call_operand.hbm [shape: f32[2,2,128], index: 3, kind: output, shape index: {1}]  }
   0x1   :  { %11 = vsyncpa [#allocation3 + $0x1], 0 }
   0x2   :  { %12 = vsyncpa [#allocation6], 0 }
   0x3   :  { %13 = vsyncpa [#allocation4], 0 }
   0x4   :  { %15 = vsyncpa [#allocation4 + $0x1], 0 }
   0x5   :  { %16 = vsyncpa [#allocation9], 0 }
   0x6   :  { %18 = vsyncpa [#allocation9 + $0x1], 0  ;;  %s804_s12 = smov 0   ;;  %s806_s13 = smov 0  }
   0x7   :  { %s808_s14 = smov 0   ;;  %s810_s15 = smov 0  }
   0x8   :  { %s812_s16 = smov 0   ;;  %s814_s17 = smov 0  }
   0x9 LB: > { %s489_s18 = sadd.s32 4294967295, %s774_s17   ;;  %s490_s19 = sadd.s32 4294967294, %s774_s17   ;;  %s774_s17 = sphi %s814_s17, %s24_s17   ;;  %s770_s16 = sphi %s812_s16, %s1028_s16   ;;  %s766_s15 = sphi %s810_s15, %s1027_s15   ;;  %s762_s14 = sphi %s808_s14, %s1026_s14   ;;  %s758_s13 = sphi %s806_s13, %s1025_s13   ;;  %s754_s12 = sphi %s804_s12, %s1024_s12  }
   0xa   : > { %p58_p0 = scmp.ne.s32.totalorder %s758_s13, %s754_s12  ;;  %p838_p1 = scmp.eq.s32.totalorder %s489_s18, 0 }
   0xb   : > { %p842_p2 = scmp.eq.s32.totalorder %s489_s18, 1  ;;  %p111_p3 = scmp.eq.s32.totalorder %s490_s19, 1 }
   0xc   : > { %p848_p4 = por %p838_p1, %p58_p0  ;;  %p491_p5 = scmp.ge.s32.totalorder %s774_s17, 1 }
   0xd   : > { %p853_p6 = por %p111_p3, %p58_p0  ;;  %p144_p7 = scmp.lt.s32.totalorder %s774_s17, 3 }
   0xe   : > { %s1014_s22 = scalar_select %p848_p4, 1, 0 }
   0xf   : > { %s1015_s23 = scalar_select %p853_p6, 1, 0 }
  0x10   : > { %p858_p8 = pnand %p491_p5, %p144_p7  ;;  %s776_s25 = smov [#allocation5]  }
  0x11   : > { %s156_s26 = sshll.u32 %s776_s25, 4  ;;  %s36_s28 = sadd.s32 1, %s770_s16  ;;  %s157_s26 = int_to_ptr.vmem [resolvable:$true] %s156_s26 }
  0x12   : > { %p534_p9 = pneg %p858_p8  ;;  %s617_s29 = scalar_lea.vmem %s157_s26, 512 }
  0x13   : > { %p618_p13 = scmp.ne.s32.totalorder %s157_s26, %s617_s29  ;;  %p625_p5 = scmp.lt.s32.totalorder %s157_s26, %s157_s26 }
  0x14   : > { %p867_p11 = pnand %p534_p9, %p838_p1  ;;  %p626_p7 = scmp.lt.s32.totalorder %s617_s29, %s617_s29 }
  0x16   : > { %p608_p12 = pneg %p867_p11  ;;  %p627_p6 = por %p626_p7, %p625_p5 }
  0x18   : > { %p620_p0 = pnand %p618_p13, %p608_p12 }
  0x1a   : > { %p621_p3 = pneg %p620_p0 }
  0x1c   : > { %p628_p4 = pnand %p627_p6, %p621_p3 }
  0x1e   : > { %631 = shalt.err (!%p628_p4)
}
  0x1f   : > { %s777_s30 = smov 128   ;;  %s778_s4 = smov 8  }
  0x20   : > { %537 = dma.hbm_to_vmem [thread:$0]  (!%p867_p11), %s1008_s1, 512, %s157_s26, [#allocation6], %s777_s30, %s777_s30, %s778_s4  }
  0x21   : > { %p38_p6 = scmp.ge.s32.totalorder %s36_s28, 2  ;;  %s45_s7 = sadd.s32 1, %s762_s14 }
  0x22   : > { %p52_p4 = scmp.ne.s32.totalorder %s762_s14, %s758_s13  ;;  %p53_p9 = scmp.eq.s32.totalorder %s774_s17, 0 }
  0x23   : > { %s1030_s28 = smov (%p38_p6, %s36_s28), 0  ;;  %p550_p0 = scmp.lt.s32.totalorder %s774_s17, 2 }
  0x24   : > { %p885_p12 = por %p53_p9, %p52_p4  ;;  %p891_p13 = por %p842_p2, %p52_p4 }
  0x25   : > { %s42_s10 = ssub.s32 %s770_s16, %s1030_s28  ;;  %s170_s11 = sand.u32 1, %s762_s14  }
  0x26   : > { %p43_p11 = scmp.eq.s32.totalorder %s42_s10, 0  ;;  %s494_s18 = sshll.u32 %s170_s11, 3 }
  0x27   : > { %s495_s25 = sshll.u32 %s770_s16, 7  ;;  %s174_s30 = scalar_lea.vmem [#allocation2], %s494_s18 }
  0x28   : > { %s900_s19 = scalar_select %p43_p11, %s762_s14, %s45_s7  }
  0x29   : > { %s180_s29 = scalar_lea.hbm %s1007_s0, %s495_s25  ;;  %s182_s4 = sshll.u32 %s174_s30, 4  ;;  %s183_s4 = int_to_ptr.vmem [resolvable:$true] %s182_s4 }
  0x2a   : > { %p908_p2 = pnand %p550_p0, %p885_p12  ;;  %s171_s5 = scalar_lea.sflag [#allocation3], %s170_s11 }
  0x2b   : > { %s645_s6 = scalar_lea.vmem %s183_s4, 128  ;;  %s779_s7 = smov [#allocation2]  }
  0x2c   : > { %p634_p3 = pneg %p908_p2  ;;  %p646_p5 = scmp.ne.s32.totalorder %s183_s4, %s645_s6 }
  0x2d   : > { %s650_s10 = sshll.u32 %s779_s7, 4  ;;  %s651_s10 = int_to_ptr.vmem [resolvable:$false] %s650_s10 }
  0x2e   : > { %p648_p7 = pnand %p646_p5, %p634_p3  ;;  %s652_s25 = scalar_lea.vmem %s651_s10, 256 }
  0x2f   : > { %p653_p4 = scmp.lt.s32.totalorder %s183_s4, %s651_s10  ;;  %p654_p9 = scmp.lt.s32.totalorder %s652_s25, %s645_s6 }
  0x30   : > { %p649_p6 = pneg %p648_p7 }
  0x31   : > { %p655_p11 = por %p654_p9, %p653_p4 }
  0x33   : > { %p656_p10 = pnand %p655_p11, %p649_p6 }
  0x35   : > { %659 = shalt.err (!%p656_p10)
}
  0x36   : > { %541 = dma.hbm_to_vmem [thread:$0]  (!%p908_p2), %s180_s29, 128, %s183_s4, %s171_s5  }
  0x37   : > { %191 = sbr.rel (%p858_p8) target bundleno = 306 (0x132), region = 28  ;;  %s919_s8 = sand.u32 (!%p858_p8), 1, %s758_s13  }
  0x38   : > { %s497_s11 = sshll.u32 (!%p858_p8), %s919_s8, 3  ;;  %s194_s18 = scalar_lea.sflag (!%p858_p8), [#allocation3], %s919_s8 }
  0x39   : > { %s197_s26 = scalar_lea.vmem (!%p858_p8), [#allocation2], %s497_s11  ;;  %p1021_p12 = scmp.ne.s32.totalorder (!%p858_p8), %s1014_s22, 0 }
  0x3c   : > { %737 = dma.done.wait (%p1021_p12), %s194_s18, 128  }
  0x3d   : > { %739 = vsyncadd (%p1021_p12), %s194_s18, 4294967168 }
  0x3e   : > { %741 = dma.done.wait (%p838_p1), [#allocation6], 512  }
  0x3f   : > { %743 = vsyncadd (%p838_p1), [#allocation6], 4294966784  ;;  %v780_v0 = vmov 0.0   ;;  %vm781_vm0 = vmmov 0   ;;  %v240_v1 = vld [vmem:[#allocation5 + $0x18] sm:$0xff]  ;;  %v239_v2 = vld [vmem:[#allocation5 + $0x10] sm:$0xff] }
  0x40   : > { %513 = vmatprep.subr.mxu0 %v780_v0  ;;  %521 = vmatprep.mubr.msk.f32.mxu0 %vm781_vm0, %v780_v0  ;;  %v238_v3 = vld [vmem:[#allocation5 + $0x8] sm:$0xff]  ;;  %v237_v4 = vld [vmem:[#allocation5] sm:$0xff]  ;;  %v236_v5 = vld [vmem:[%s197_s26] sm:$0xff]  ;;  %vm241_vm1 = vcmask 261120   ;;  %s500_s20 = sshll.u32 %s919_s8, 1  ;;  %s504_s24 = sshll.u32 %s766_s15, 7 }
  0x41   : > { %514 = vmatpush3.msra.mxu0 %v240_v1  ;;  %s932_s22 = scalar_lea.vmem [#allocation8], %s500_s20  ;;  %s221_s27 = scalar_lea.vmem [#allocation7], %s497_s11 }
  0x42   : > { %515 = vmatprep.subr.mxu0 %v780_v0  ;;  %235 = vst [vmem:[%s932_s22] sm:$0x3] %v780_v0  ;;  %s354_s29 = sshll.u32 %s221_s27, 4  ;;  %s939_s21 = scalar_lea.hbm %s1009_s2, %s504_s24  ;;  %s941_s29 = int_to_ptr.vmem [resolvable:$true] %s354_s29 }
  0x43   : > { %516 = vmatpush3.msra.mxu0 %v239_v2  ;;  %s335_s5 = scalar_lea.sflag [#allocation4], %s919_s8  ;;  %s660_s6 = scalar_lea.vmem %s941_s29, 128 }
  0x44   : > { %517 = vmatprep.subr.mxu0 %v780_v0  ;;  %p661_p1 = scmp.ne.s32.totalorder %s941_s29, %s660_s6  ;;  %s782_s7 = smov [#allocation7]  }
  0x45   : > { %518 = vmatpush3.msra.mxu0 %v238_v3  ;;  %s664_s10 = sshll.u32 %s782_s7, 4  ;;  %s665_s10 = int_to_ptr.vmem [resolvable:$false] %s664_s10 }
  0x46   : > { %519 = vmatprep.subr.mxu0 %v780_v0  ;;  %p662_p8 = pnand %p661_p1, %p891_p13  ;;  %s666_s25 = scalar_lea.vmem %s665_s10, 256 }
  0x47   : > { %520 = vmatpush3.msra.mxu0 %v237_v4  ;;  %p667_p0 = scmp.lt.s32.totalorder %s941_s29, %s665_s10  ;;  %p668_p2 = scmp.lt.s32.totalorder %s666_s25, %s660_s6 }
  0x48   : > { %522 = vmatmul.mubr.msk.f32.vlgmr.msra.gmra.mxu0 %vm241_vm1, %v236_v5  ;;  %p663_p10 = pneg %p662_p8 }
  0x49   : > { %p669_p3 = por %p668_p2, %p667_p0 }
  0x4b   : > { %p670_p5 = pnand %p669_p3, %p663_p10 }
 0x108   : > { %v311_v6 = vpop.f32.mrf.mxu0 }
 0x109   : > { %v316_v7 = vrot.slane %v311_v6, 4  ;;  %v322_v8 = vmul.f32 %v311_v6, %v311_v6  ;;  %315 = vst [vmem:[%s221_s27] sm:$0xff] %v311_v6 }
 0x10a   : > { %v523_v9 = vpop.f32.mrf.mxu0 }
 0x10b   : > { %673 = shalt.err (!%p670_p5)
}
 0x10c   : > { %s674_s11 = scalar_lea.hbm %s939_s21, 128  ;;  %s678_s20 = scalar_lea.hbm %s1009_s2, 256 }
 0x10d   : > { %p675_p7 = scmp.ne.s32.totalorder %s939_s21, %s674_s11  ;;  %p679_p9 = scmp.lt.s32.totalorder %s939_s21, %s1009_s2 }
 0x10e   : > { %p680_p11 = scmp.lt.s32.totalorder %s678_s20, %s674_s11 }
 0x10f   : > { %p676_p6 = pnand %p675_p7, %p891_p13 }
 0x110   : > { %p681_p12 = por %p680_p11, %p679_p9 }
 0x111   : > { %p677_p4 = pneg %p676_p6 }
 0x113   : > { %p682_p1 = pnand %p681_p12, %p677_p4 }
 0x115   : > { %685 = shalt.err (!%p682_p1)
}
 0x116   : > { %530 = dma.vmem_to_hbm [thread:$0]  (%p891_p13), %s941_s29, 128, %s939_s21, %s335_s5   ;;  %v317_v10 = vadd.f32 %v316_v7, %v311_v6  ;;  %v323_v11 = vrot.slane %v322_v8, 4  ;;  %vm330_vm2 = vcmask 1040384   ;;  %v329_v21 = vld [vmem:[%s932_s22] sm:$0x3] }
 0x117   : > { %s505_s30 = sshll.u32 %s766_s15, 5  ;;  %s367_s4 = sshll.u32 %s932_s22, 4  ;;  %s368_s4 = int_to_ptr.vmem [resolvable:$true] %s367_s4 }
 0x118   : > { %v318_v12 = vrot.slane %v317_v10, 2  ;;  %v324_v13 = vadd.f32 %v323_v11, %v322_v8  ;;  %s365_s5 = scalar_lea.hbm %s1010_s3, %s505_s30  ;;  %s340_s6 = scalar_lea.sflag [#allocation9], %s919_s8 }
 0x119   : > { %s686_s7 = scalar_lea.vmem %s368_s4, 32  ;;  %s783_s10 = smov [#allocation8]  }
 0x11a   : > { %v319_v14 = vadd.f32 %v318_v12, %v317_v10  ;;  %v325_v15 = vrot.slane %v324_v13, 2  ;;  %p687_p8 = scmp.ne.s32.totalorder %s368_s4, %s686_s7  ;;  %s690_s25 = sshll.u32 %s783_s10, 4  ;;  %s691_s25 = int_to_ptr.vmem [resolvable:$false] %s690_s25 }
 0x11b   : > { %s692_s11 = scalar_lea.vmem %s691_s25, 64  ;;  %p693_p2 = scmp.lt.s32.totalorder %s368_s4, %s691_s25 }
 0x11c   : > { %v320_v16 = vrot.slane %v319_v14, 1  ;;  %v326_v17 = vadd.f32 %v325_v15, %v324_v13  ;;  %p688_p10 = pnand %p687_p8, %p891_p13  ;;  %p694_p3 = scmp.lt.s32.totalorder %s692_s11, %s686_s7 }
 0x11e   : > { %v327_v18 = vrot.slane %v326_v17, 1  ;;  %v321_v19 = vadd.f32 %v320_v16, %v319_v14  ;;  %p689_p0 = pneg %p688_p10  ;;  %p695_p5 = por %p694_p3, %p693_p2 }
 0x120   : > { %v328_v20 = vadd.f32 %v327_v18, %v326_v17  ;;  %p696_p7 = pnand %p695_p5, %p689_p0 }
 0x122   : > { %v331_v22 = vsel %vm330_vm2, %v321_v19, %v328_v20 }
 0x123   : > { %v332_v23 = vadd.f32 %v331_v22, %v329_v21 }
 0x125   : > { %333 = vst [vmem:[%s932_s22] sm:$0x3] %v332_v23 }
 0x126   : > { %699 = shalt.err (!%p696_p7)
}
 0x127   : > { %s700_s15 = scalar_lea.hbm %s365_s5, 32  ;;  %s704_s18 = scalar_lea.hbm %s1010_s3, 64 }
 0x128   : > { %p701_p6 = scmp.ne.s32.totalorder %s365_s5, %s700_s15  ;;  %p705_p11 = scmp.lt.s32.totalorder %s365_s5, %s1010_s3 }
 0x129   : > { %p706_p12 = scmp.lt.s32.totalorder %s704_s18, %s700_s15 }
 0x12a   : > { %p702_p4 = pnand %p701_p6, %p891_p13 }
 0x12b   : > { %p707_p1 = por %p706_p12, %p705_p11 }
 0x12c   : > { %p703_p9 = pneg %p702_p4 }
 0x12e   : > { %p708_p8 = pnand %p707_p1, %p703_p9 }
 0x130   : > { %711 = shalt.err (!%p708_p8)
}
 0x131   : > { %531 = dma.vmem_to_hbm [thread:$0]  (%p891_p13), %s368_s4, 32, %s365_s5, %s340_s6  }
 0x132 PF: > { %s379_s24 = sand.u32 1, %s754_s12   ;;  %p1022_p10 = scmp.ne.s32.totalorder %s1015_s23, 0 }
 0x133   : > { %p1023_p0 = scmp.ge.s32.totalorder %s774_s17, 2  ;;  %s380_s27 = scalar_lea.sflag [#allocation4], %s379_s24 }
 0x135   : > { %p543_p2 = pnand %p1023_p0, %p1022_p10 }
 0x137   : > { %p544_p3 = pneg %p543_p2 }
 0x139   : > { %745 = dma.done.wait (%p544_p3), %s380_s27, 128  }
 0x13a   : > { %747 = vsyncadd (%p544_p3), %s380_s27, 4294967168  ;;  %s389_s30 = scalar_lea.sflag [#allocation9], %s379_s24 }
 0x13b   : > { %749 = dma.done.wait (%p544_p3), %s389_s30, 32  }
 0x13c   : > { %751 = vsyncadd (%p544_p3), %s389_s30, 4294967264  ;;  %s24_s17 = sadd.s32 1, %s774_s17   ;;  %s1024_s12 = smov %s758_s13 }
 0x13d   : > { %p21_p5 = scmp.ge.s32.totalorder %s24_s17, 4   ;;  %s1025_s13 = smov %s762_s14 }
 0x13e   : > { %s1026_s14 = smov %s900_s19  ;;  %s1027_s15 = smov %s770_s16 }
 0x13f   : > { %s1028_s16 = smov %s1030_s28  ;;  %23 = sbr.rel (!%p21_p5) target bundleno = 9 (0x9), region = 98 }
 0x144   :  { %394 = vsyncpa [#allocation3], 1 }
 0x145   :  { %396 = vsyncpa [#allocation3 + $0x1], 1 }
 0x146   :  { %397 = vsyncpa [#allocation6], 1 }
 0x147   :  { %398 = vsyncpa [#allocation4], 1 }
 0x148   :  { %400 = vsyncpa [#allocation4 + $0x1], 1 }
 0x149   :  { %401 = vsyncpa [#allocation9], 1 }
 0x14a   :  { %403 = vsyncpa [#allocation9 + $0x1], 1 }

</bundles_post_ra>
